<compile_context>
chip_gen: v7x
topology: tpu7x:2x2x1
jax: 0.10.0
libtpu: 0.0.40
codegen_flags: <defaults>
</compile_context>

<pallas_src>
import functools

import jax
import jax.numpy as jnp
from jax.experimental import pallas as pl
from jax.experimental.pallas import tpu as pltpu

LANES = 128
SUBLANES = 8
MAX_BLOCK_BYTES = 2 * 1024 * 1024     # per-input block (f32 -> 4096 rows x 128 lanes)
VMEM_LIMIT_BYTES = 32 * 1024 * 1024   # explicit scoped-VMEM headroom (v5e default: 16 MiB)
_PALLAS_MIN_ELEMS = 32 * 1024         # below this, plain XLA beats kernel-launch overhead


def _num_tensorcores():
    """2 TensorCores per chip on v7x; 1 on v5e / v6e (and as a safe default)."""
    try:
        kind = jax.devices()[0].device_kind.lower()
    except Exception:
        return 1
    return 2 if "v7" in kind else 1


def _sublane_granularity(*dtypes):
    """Native sublane packing: 8 rows (32-bit), 16 (bf16/f16), 32 (8-bit)."""
    g = 8
    for dt in dtypes:
        itemsize = jnp.dtype(dt).itemsize
        g = max(g, 8 * max(1, 4 // max(1, itemsize)))
    return g


def _my_loss_kernel(x_ref, y_ref, o_ref, *, row_tile, rows_per_core, needs_mask):
    s = pl.program_id(1)

    @pl.when(s == 0)
    def _init():
        o_ref[...] = jnp.zeros_like(o_ref)

    x = x_ref[...].astype(jnp.float32)
    y = y_ref[...].astype(jnp.float32)
    d = (x - y) * (y * 4.0 + 1.0)
    sq = d * d                                    # (row_tile, LANES) f32

    def _accum(vals):
        # Vreg-shaped partial sums: fold along (8,128) tile boundaries (pure
        # VPU adds).  The single cross-lane reduce happens once, in the
        # wrapper, on the tiny (NCORES, 8, 128) output.
        o_ref[...] += jnp.sum(
            vals.reshape(row_tile // SUBLANES, SUBLANES, LANES), axis=0
        )

    if needs_mask:
        # Only the last grid step can hold a partial block; gate the mask so
        # every other step stays at the minimal per-element VALU count.
        last = pl.num_programs(1) - 1

        @pl.when(s != last)
        def _full():
            _accum(sq)

        @pl.when(s == last)
        def _partial():
            r = jax.lax.broadcasted_iota(jnp.int32, sq.shape, 0)
            _accum(jnp.where(s * row_tile + r < rows_per_core, sq, 0.0))
    else:
        _accum(sq)


def _jnp_sq_sum(x, y):
    xf = x.astype(jnp.float32)
    yf = y.astype(jnp.float32)
    d = (xf - yf) * (yf * 4.0 + 1.0)
    return jnp.sum(d * d)


def my_loss(x, y, *, min_pallas_elems=_PALLAS_MIN_ELEMS):
    """Equivalent of torch.mean(torch.pow((x - y) * (y * 4 + 1), 2))."""
    assert x.shape == y.shape
    out_dtype = jnp.promote_types(x.dtype, y.dtype)
    n_elems = x.size

    # Small-input fallback: kernel-launch + grid overhead would dominate.
    if n_elems < min_pallas_elems:
        return (_jnp_sq_sum(x, y) / jnp.float32(max(n_elems, 1))).astype(out_dtype)

    ncores = _num_tensorcores()
    gran = _sublane_granularity(x.dtype, y.dtype)
    itemsize = max(jnp.dtype(x.dtype).itemsize, jnp.dtype(y.dtype).itemsize)

    # Aligned prefix handled by the kernel; the < chunk remainder (if any) is
    # folded in with a tiny jnp expression (no full-array pad / copy).
    chunk = ncores * gran * LANES
    main = (n_elems // chunk) * chunk
    if main == 0:
        return (_jnp_sq_sum(x, y) / jnp.float32(n_elems)).astype(out_dtype)

    x_flat = x.reshape(-1)            # contiguous reshape: bitcast, no HBM copy
    y_flat = y.reshape(-1)

    rem = n_elems - main
    if rem:
        tail_sum = _jnp_sq_sum(x_flat[main:], y_flat[main:])
        x_main, y_main = x_flat[:main], y_flat[:main]
    else:
        tail_sum = None
        x_main, y_main = x_flat, y_flat

    rows_per_core = main // (ncores * LANES)          # multiple of gran (>= 8)
    max_block_rows = max(gran, (MAX_BLOCK_BYTES // (LANES * itemsize)) // gran * gran)
    row_tile = min(max_block_rows, rows_per_core)     # multiple of gran
    steps = pl.cdiv(rows_per_core, row_tile)
    needs_mask = (rows_per_core % row_tile) != 0

    x3 = x_main.reshape(ncores, rows_per_core, LANES)
    y3 = y_main.reshape(ncores, rows_per_core, LANES)

    kernel = functools.partial(
        _my_loss_kernel,
        row_tile=row_tile,
        rows_per_core=rows_per_core,
        needs_mask=needs_mask,
    )

    cost = pl.CostEstimate(
        flops=6 * main,
        transcendentals=0,
        bytes_accessed=main * (jnp.dtype(x.dtype).itemsize + jnp.dtype(y.dtype).itemsize)
        + ncores * SUBLANES * LANES * 4,
    )

    partials = pl.pallas_call(
        kernel,
        out_shape=jax.ShapeDtypeStruct((ncores, SUBLANES, LANES), jnp.float32),
        grid_spec=pltpu.PrefetchScalarGridSpec(
            num_scalar_prefetch=0,
            grid=(ncores, steps),
            in_specs=[
                pl.BlockSpec((None, row_tile, LANES), lambda c, s: (c, s, 0)),
                pl.BlockSpec((None, row_tile, LANES), lambda c, s: (c, s, 0)),
            ],
            out_specs=pl.BlockSpec((None, SUBLANES, LANES), lambda c, s: (c, 0, 0)),
        ),
        compiler_params=pltpu.CompilerParams(
            dimension_semantics=("parallel", "arbitrary"),
            vmem_limit_bytes=VMEM_LIMIT_BYTES,
        ),
        cost_estimate=cost,
    )(x3, y3)

    total = jnp.sum(partials)
    if tail_sum is not None:
        total = total + tail_sum
    return (total / jnp.float32(n_elems)).astype(out_dtype)


if __name__ == "__main__":
    key = jax.random.PRNGKey(0)

    def ref_loss(x, y):
        xf = x.astype(jnp.float32)
        yf = y.astype(jnp.float32)
        return jnp.mean(((xf - yf) * (yf * 4.0 + 1.0)) ** 2)

    cases = [
        # (shape, force_pallas)
        ((2, 4, 16, 16), False),     # small-input fallback path
        ((2, 4, 16, 16), True),      # kernel path at the spec shape (zero-copy)
        ((3, 5, 17, 13), True),      # ragged size: aligned prefix + jnp tail
        ((1, 5, 256, 256), False),   # single-step kernel path
        ((2, 5, 384, 384), False),   # multi-step path, gated mask on last block
    ]

    for i, (shape, force) in enumerate(cases):
        kx, ky = jax.random.split(jax.random.fold_in(key, i))
        x = jax.random.normal(kx, shape, dtype=jnp.float32)
        y = jax.random.normal(ky, shape, dtype=jnp.float32)
        kwargs = {"min_pallas_elems": 0} if force else {}
        out = jax.block_until_ready(my_loss(x, y, **kwargs))
        ref = ref_loss(x, y)
        assert jnp.allclose(out, ref, rtol=5e-5, atol=1e-6), (shape, out, ref)

    print("KERNEL_OK")
</pallas_src>

<mosaic_0001>
module attributes {stable_mosaic.version = 11 : i64} {
  func.func @_my_loss_kernel(%arg0: i32, %arg1: i32, %arg2: memref<1x16x128xf32, #tpu.memory_space<vmem>>, %arg3: memref<1x16x128xf32, #tpu.memory_space<vmem>>, %arg4: memref<1x8x128xf32, #tpu.memory_space<vmem>>) attributes {dimension_semantics = [#tpu.dimension_semantics<parallel>, #tpu.dimension_semantics<arbitrary>], iteration_bounds = array<i64: 1, 1>, scalar_prefetch = 0 : i64, scratch_operands = 0 : i64, tpu.core_type = #tpu.core_type<tc>, window_params = [{transform_indices = @transform_0, window_bounds = array<i64: 1, 16, 128>}, {transform_indices = @transform_1, window_bounds = array<i64: 1, 16, 128>}, {transform_indices = @transform_2, window_bounds = array<i64: 1, 8, 128>}]} {
    %c0_i32 = arith.constant 0 : i32
    %0 = arith.cmpi eq, %arg1, %c0_i32 : i32
    %1 = arith.extui %0 : i1 to i32
    %c0_i32_0 = arith.constant 0 : i32
    %2 = arith.cmpi ne, %1, %c0_i32_0 : i32
    scf.if %2 {
      %cst_14 = arith.constant 0.000000e+00 : f32
      %22 = vector.broadcast %cst_14 : f32 to vector<8x128xf32>
      %c0_15 = arith.constant 0 : index
      %c0_16 = arith.constant 0 : index
      %c0_17 = arith.constant 0 : index
      %23 = vector.load %arg4[%c0_15, %c0_16, %c0_17] : memref<1x8x128xf32, #tpu.memory_space<vmem>>, vector<1x8x128xf32>
      %24 = vector.shape_cast %23 : vector<1x8x128xf32> to vector<8x128xf32>
      %25 = vector.shape_cast %22 : vector<8x128xf32> to vector<1x8x128xf32>
      tpu.vector_store %arg4[%c0_15, %c0_16, %c0_17], %25 {strides = array<i32>} : memref<1x8x128xf32, #tpu.memory_space<vmem>>, vector<1x8x128xf32>,
    } else {
    }
    %c0 = arith.constant 0 : index
    %c0_1 = arith.constant 0 : index
    %c0_2 = arith.constant 0 : index
    %3 = vector.load %arg2[%c0, %c0_1, %c0_2] : memref<1x16x128xf32, #tpu.memory_space<vmem>>, vector<1x16x128xf32>
    %4 = vector.shape_cast %3 : vector<1x16x128xf32> to vector<16x128xf32>
    %c0_3 = arith.constant 0 : index
    %c0_4 = arith.constant 0 : index
    %c0_5 = arith.constant 0 : index
    %5 = vector.load %arg3[%c0_3, %c0_4, %c0_5] : memref<1x16x128xf32, #tpu.memory_space<vmem>>, vector<1x16x128xf32>
    %6 = vector.shape_cast %5 : vector<1x16x128xf32> to vector<16x128xf32>
    %7 = arith.subf %4, %6 : vector<16x128xf32>
    %cst = arith.constant 4.000000e+00 : f32
    %8 = vector.broadcast %cst : f32 to vector<16x128xf32>
    %9 = arith.mulf %6, %8 : vector<16x128xf32>
    %cst_6 = arith.constant 1.000000e+00 : f32
    %10 = vector.broadcast %cst_6 : f32 to vector<16x128xf32>
    %11 = arith.addf %9, %10 : vector<16x128xf32>
    %12 = arith.mulf %7, %11 : vector<16x128xf32>
    %13 = arith.mulf %12, %12 : vector<16x128xf32>
    %c0_7 = arith.constant 0 : index
    %c0_8 = arith.constant 0 : index
    %c0_9 = arith.constant 0 : index
    %14 = vector.load %arg4[%c0_7, %c0_8, %c0_9] : memref<1x8x128xf32, #tpu.memory_space<vmem>>, vector<1x8x128xf32>
    %15 = vector.shape_cast %14 : vector<1x8x128xf32> to vector<8x128xf32>
    %16 = vector.shape_cast %13 : vector<16x128xf32> to vector<2x8x128xf32>
    %cst_10 = arith.constant dense<0.000000e+00> : vector<8x128xf32>
    %17 = vector.multi_reduction <add>, %16, %cst_10 [0] : vector<2x8x128xf32> to vector<8x128xf32>
    %18 = arith.addf %15, %17 : vector<8x128xf32>
    %c0_11 = arith.constant 0 : index
    %c0_12 = arith.constant 0 : index
    %c0_13 = arith.constant 0 : index
    %19 = vector.load %arg4[%c0_11, %c0_12, %c0_13] : memref<1x8x128xf32, #tpu.memory_space<vmem>>, vector<1x8x128xf32>
    %20 = vector.shape_cast %19 : vector<1x8x128xf32> to vector<8x128xf32>
    %21 = vector.shape_cast %18 : vector<8x128xf32> to vector<1x8x128xf32>
    tpu.vector_store %arg4[%c0_11, %c0_12, %c0_13], %21 {strides = array<i32>} : memref<1x8x128xf32, #tpu.memory_space<vmem>>, vector<1x8x128xf32>,
    return
  }
  func.func @transform_0(%arg0: i32, %arg1: i32) -> (i32, i32, i32) {
    %c0_i32 = arith.constant 0 : i32
    %c0_i32_0 = arith.constant 0 : i32
    return %arg0, %arg1, %c0_i32 : i32, i32, i32
  }
  func.func @transform_1(%arg0: i32, %arg1: i32) -> (i32, i32, i32) {
    %c0_i32 = arith.constant 0 : i32
    %c0_i32_0 = arith.constant 0 : i32
    return %arg0, %arg1, %c0_i32 : i32, i32, i32
  }
  func.func @transform_2(%arg0: i32, %arg1: i32) -> (i32, i32, i32) {
    %c0_i32 = arith.constant 0 : i32
    %c0_i32_0 = arith.constant 0 : i32
    %c0_i32_1 = arith.constant 0 : i32
    return %arg0, %c0_i32, %c0_i32_0 : i32, i32, i32
  }
}

</mosaic_0001>

<bundles_post_ra>
// kernel: tpu_custom_call.1
= control target key start
LH: loop header
LB: loop body
LE: loop exit
PB: predicated region body
PF: predicated region fallthrough
CT: control target
= control target key end

     0   :  { %7 = vsyncpa [#allocation3], 0  ;;  %s213_s0 = inlined_call_operand.hbm [shape: f32[1,16,128], index: 0, kind: input, shape index: {}]   ;;  %s214_s1 = inlined_call_operand.hbm [shape: f32[1,16,128], index: 1, kind: input, shape index: {}]   ;;  %s215_s2 = inlined_call_operand.hbm [shape: f32[1,8,128], index: 2, kind: output, shape index: {}]  }
   0x1   :  { %8 = vsyncpa [#allocation6], 0 }
   0x2   :  { %9 = vsyncpa [#allocation4], 0  ;;  %s157_s9 = smov [#allocation2]   ;;  %s85_s13 = scalar_lea.hbm %s213_s0, 256 }
   0x3   :  { %s15_s10 = sshll.u32 %s157_s9, 4  ;;  %p86_p0 = scmp.ne.s32.totalorder %s213_s0, %s85_s13  ;;  %s16_s10 = int_to_ptr.vmem [resolvable:$true] %s15_s10 }
   0x4   :  { %p89_p1 = scmp.lt.u32.totalorder %s85_s13, %s213_s0 }
   0x6   :  { %p91_p2 = pnand %p89_p1, %p86_p0 }
   0x8   :  { %94 = shalt.err (!%p91_p2)
}
   0x9   :  { %s95_s18 = scalar_lea.vmem %s16_s10, 256  ;;  %p100_p4 = scmp.lt.s32.totalorder %s16_s10, %s16_s10 }
   0xa   :  { %p96_p3 = scmp.ne.s32.totalorder %s16_s10, %s95_s18  ;;  %p101_p5 = scmp.lt.s32.totalorder %s95_s18, %s95_s18 }
   0xc   :  { %p102_p6 = por %p101_p5, %p100_p4 }
   0xe   :  { %p103_p7 = pnand %p102_p6, %p96_p3 }
  0x10   :  { %106 = shalt.err (!%p103_p7)
}
  0x11   :  { %s158_s19 = smov 128   ;;  %s159_s20 = smov 8  }
  0x12   :  { %21 = dma.hbm_to_vmem [thread:$0]  %s213_s0, 256, %s16_s10, [#allocation3], %s158_s19, %s158_s19, %s159_s20  }
  0x13   :  { %s160_s23 = smov [#allocation5]   ;;  %s107_s27 = scalar_lea.hbm %s214_s1, 256 }
  0x14   :  { %s27_s24 = sshll.u32 %s160_s23, 4  ;;  %p108_p8 = scmp.ne.s32.totalorder %s214_s1, %s107_s27  ;;  %s28_s24 = int_to_ptr.vmem [resolvable:$true] %s27_s24 }
  0x15   :  { %p111_p9 = scmp.lt.u32.totalorder %s107_s27, %s214_s1 }
  0x17   :  { %p113_p10 = pnand %p111_p9, %p108_p8 }
  0x19   :  { %116 = shalt.err (!%p113_p10)
}
  0x1a   :  { %s117_s4 = scalar_lea.vmem %s28_s24, 256  ;;  %p122_p12 = scmp.lt.s32.totalorder %s28_s24, %s28_s24 }
  0x1b   :  { %p118_p11 = scmp.ne.s32.totalorder %s28_s24, %s117_s4  ;;  %p123_p13 = scmp.lt.s32.totalorder %s117_s4, %s117_s4 }
  0x1d   :  { %p124_p0 = por %p123_p13, %p122_p12 }
  0x1f   :  { %p125_p1 = pnand %p124_p0, %p118_p11 }
  0x21   :  { %128 = shalt.err (!%p125_p1)
}
  0x22   :  { %33 = dma.hbm_to_vmem [thread:$0]  %s214_s1, 256, %s28_s24, [#allocation6], %s158_s19, %s158_s19, %s159_s20  }
  0x23   :  { %151 = dma.done.wait [#allocation3], 256  }
  0x24   :  { %152 = vsyncadd [#allocation3], 4294967040 }
  0x25   :  { %153 = dma.done.wait [#allocation6], 256  }
  0x26   :  { %154 = vsyncadd [#allocation6], 4294967040  ;;  %v45_v0 = vld [vmem:[#allocation2] sm:$0xff]  ;;  %v46_v1 = vld [vmem:[#allocation2 + $0x8] sm:$0xff]  ;;  %s161_s6 = smov [#allocation7]  }
  0x27   :  { %v47_v2 = vld [vmem:[#allocation5] sm:$0xff]  ;;  %v48_v3 = vld [vmem:[#allocation5 + $0x8] sm:$0xff]  ;;  %s69_s1 = sshll.u32 %s161_s6, 4  ;;  %s70_s1 = int_to_ptr.vmem [resolvable:$true] %s69_s1 }
  0x28   :  { %v49_v4 = vsub.f32 %v45_v0, %v47_v2  ;;  %v51_v5 = vmul.f32 4.0, %v47_v2  ;;  %v50_v6 = vsub.f32 %v46_v1, %v48_v3  ;;  %v52_v7 = vmul.f32 4.0, %v48_v3  ;;  %s129_s7 = scalar_lea.vmem %s70_s1, 128  ;;  %p134_p3 = scmp.lt.s32.totalorder %s70_s1, %s70_s1 }
  0x29   :  { %p130_p2 = scmp.ne.s32.totalorder %s70_s1, %s129_s7  ;;  %p135_p4 = scmp.lt.s32.totalorder %s129_s7, %s129_s7 }
  0x2a   :  { %v53_v8 = vadd.f32 1.0, %v51_v5  ;;  %v54_v9 = vadd.f32 1.0, %v52_v7 }
  0x2b   :  { %p136_p5 = por %p135_p4, %p134_p3 }
  0x2c   :  { %v55_v10 = vmul.f32 %v53_v8, %v49_v4  ;;  %v56_v11 = vmul.f32 %v54_v9, %v50_v6 }
  0x2d   :  { %p137_p6 = pnand %p136_p5, %p130_p2 }
  0x2e   :  { %v57_v12 = vmul.f32 %v55_v10, %v55_v10  ;;  %v58_v13 = vmul.f32 %v56_v11, %v56_v11 }
  0x30   :  { %v60_v14 = vadd.f32 %v58_v13, %v57_v12 }
  0x32   :  { %62 = vst [vmem:[#allocation7] sm:$0xff] %v60_v14 }
  0x33   :  { %140 = shalt.err (!%p137_p6)
}
  0x34   :  { %s141_s10 = scalar_lea.hbm %s215_s2, 128 }
  0x35   :  { %p142_p7 = scmp.ne.s32.totalorder %s215_s2, %s141_s10  ;;  %p145_p8 = scmp.lt.u32.totalorder %s141_s10, %s215_s2 }
  0x37   :  { %p147_p9 = pnand %p145_p8, %p142_p7 }
  0x39   :  { %150 = shalt.err (!%p147_p9)
}
  0x3a   :  { %72 = dma.vmem_to_hbm [thread:$0]  %s70_s1, 128, %s215_s2, [#allocation4]  }
  0x3b   :  { %155 = dma.done.wait [#allocation4], 128  }
  0x3c   :  { %156 = vsyncadd [#allocation4], 4294967168 }
  0x3d   :  { %76 = vsyncpa [#allocation3], 1 }
  0x3e   :  { %77 = vsyncpa [#allocation6], 1 }
  0x3f   :  { %78 = vsyncpa [#allocation4], 1 }

</bundles_post_ra>
